<compile_context>
chip_gen: v5e
topology: v5e:2x2
jax: 0.10.0
libtpu: 0.0.40
codegen_flags: <defaults>
</compile_context>

<pallas_src>
import functools

import jax
import jax.numpy as jnp
import numpy as np
from jax.experimental import pallas as pl
from jax.experimental.pallas import tpu as pltpu


def stem_kernel(w_ref, b_ref, x_ref, o_ref):
    """w: (C_out, K) bf16, b: (C_out, 1) f32, x: (K, TL) bf16, o: (C_out, TL)."""
    acc = jnp.dot(w_ref[...], x_ref[...], preferred_element_type=jnp.float32)
    y = acc + b_ref[...]                                   # folded BN bias (f32)
    o_ref[...] = jnp.clip(y, 0.0, 6.0).astype(o_ref.dtype)  # ReLU6


def _pick_tile(total, cap, min_tiles=1):
    """Largest 128-multiple divisor of `total` that is <= cap, preferring one
    that leaves at least `min_tiles` grid steps along the lane axis."""
    if total <= 128 or total % 128 != 0:
        return total
    best_any, best_min = 128, None
    d, limit = 128, min(cap, total)
    while d <= limit:
        if total % d == 0:
            best_any = d
            if total // d >= min_tiles:
                best_min = d
        d += 128
    return best_min if best_min is not None else best_any


@functools.partial(jax.jit, static_argnames=("eps", "max_tile_lanes", "out_dtype"))
def mobile_stem_forward(x_nchw, weight, gamma, beta, run_mean, run_var,
                        eps=1e-5, max_tile_lanes=8192, out_dtype=jnp.bfloat16):
    """x_nchw: (N, C_in, H, W); weight: (C_out, C_in, KH, KW) PyTorch layout."""
    N, C_in, H, W = x_nchw.shape
    C_out, _, KH, KW = weight.shape
    stride, pad = 2, 1
    OH = (H + 2 * pad - KH) // stride + 1
    OW = (W + 2 * pad - KW) // stride + 1
    S = OH * OW
    K = KH * KW * C_in

    # ---- fold BN (inference): scale into the weights, bias stays ----
    scale = gamma / jnp.sqrt(run_var + eps)                        # (C_out,)
    bias = (beta - run_mean * scale).astype(jnp.float32).reshape(C_out, 1)
    w = weight * scale[:, None, None, None]                        # (C_out, C_in, KH, KW)
    # contraction dim order = (kh, kw, c) to match the stacked-tap tensor
    w = jnp.transpose(w, (0, 2, 3, 1)).reshape(C_out, K).astype(jnp.bfloat16)

    # ---- stacked-tap tensor (im2col along the channel axis), built as one
    #      fused XLA copy under jit (no per-tap HBM materialization) ----
    xb = x_nchw.astype(jnp.bfloat16)
    xp = jnp.pad(xb, ((0, 0), (0, 0), (pad, pad), (pad, pad)))
    taps = []
    for kh in range(KH):
        for kw in range(KW):
            taps.append(xp[:, :, kh:kh + stride * OH:stride,
                               kw:kw + stride * OW:stride])        # (N, C_in, OH, OW)

    if S % 128 == 0:
        # Transpose-free path: output stays in flattened-NCHW (N, C_out, S).
        stacked = jnp.stack(taps, axis=1).reshape(N, K, S)         # (N, K, S)
        n_grid, lanes = N, S
        min_tiles = 2 if N == 1 else 1                             # v7x: keep both TCs busy
    else:
        # Ragged S: fold batch into the lane axis (pad to a 128 multiple)
        # so stores stay lane-dense (no masked vst).
        stacked = jnp.stack(taps, axis=0)                          # (9, N, C_in, OH, OW)
        stacked = jnp.transpose(stacked, (0, 2, 1, 3, 4)).reshape(K, N * S)
        L = N * S
        L_pad = ((L + 127) // 128) * 128
        if L_pad != L:
            stacked = jnp.pad(stacked, ((0, 0), (0, L_pad - L)))
        stacked = stacked[None]                                    # (1, K, L_pad)
        n_grid, lanes = 1, L_pad
        min_tiles = 2

    tl = _pick_tile(lanes, max_tile_lanes, min_tiles=min_tiles)
    grid = (n_grid, lanes // tl)

    flops = 2 * n_grid * lanes * K * C_out
    bytes_accessed = (stacked.size * 2                      # bf16 stacked taps
                      + C_out * K * 2                       # bf16 weights
                      + C_out * 4                           # f32 bias
                      + n_grid * C_out * lanes * jnp.dtype(out_dtype).itemsize)

    out = pl.pallas_call(
        stem_kernel,
        out_shape=jax.ShapeDtypeStruct((n_grid, C_out, lanes), out_dtype),
        grid=grid,
        in_specs=[
            pl.BlockSpec((C_out, K), lambda n, t: (0, 0)),             # weights (resident)
            pl.BlockSpec((C_out, 1), lambda n, t: (0, 0)),             # BN bias (resident)
            pl.BlockSpec((pl.Squeezed(), K, tl), lambda n, t: (n, 0, t)),
        ],
        out_specs=pl.BlockSpec((pl.Squeezed(), C_out, tl), lambda n, t: (n, 0, t)),
        compiler_params=pltpu.CompilerParams(
            dimension_semantics=("parallel", "parallel")),
        cost_estimate=pl.CostEstimate(flops=flops, transcendentals=0,
                                      bytes_accessed=bytes_accessed),
    )(w, bias, stacked)

    if S % 128 == 0:
        # (N, C_out, OH*OW) -> NCHW: pure metadata, no transpose.
        return out.reshape(N, C_out, OH, OW)
    # Fallback (ragged S): tiny un-fold transpose on the small output.
    y = out[0, :, :N * S].reshape(C_out, N, OH, OW)
    return jnp.transpose(y, (1, 0, 2, 3))


def _reference(x_nchw, weight, gamma, beta, run_mean, run_var, eps=1e-5):
    """Pure-JAX f32 reference (lax conv) for a correctness sanity check."""
    y = jax.lax.conv_general_dilated(
        x_nchw, weight, window_strides=(2, 2), padding=((1, 1), (1, 1)),
        dimension_numbers=("NCHW", "OIHW", "NCHW"))
    scale = (gamma / jnp.sqrt(run_var + eps)).reshape(1, -1, 1, 1)
    bias = (beta - run_mean * gamma / jnp.sqrt(run_var + eps)).reshape(1, -1, 1, 1)
    return jnp.clip(y * scale + bias, 0.0, 6.0)


if __name__ == "__main__":
    key = jax.random.PRNGKey(0)
    k_x, k_w = jax.random.split(key)

    # Small shapes consistent with the module: MobileStem(4 -> 32), stride 2.
    N, C_in, H, W = 2, 4, 16, 16
    C_out = 32

    x = jax.random.normal(k_x, (N, C_in, H, W), dtype=jnp.float32)
    weight = jax.random.normal(k_w, (C_out, C_in, 3, 3), dtype=jnp.float32) * 0.1

    # Deterministic synthetic BN parameters (no checkpoint load).
    gamma = 1.0 + 0.01 * jnp.arange(C_out, dtype=jnp.float32)
    beta = 0.05 * jnp.arange(C_out, dtype=jnp.float32)
    run_mean = 0.02 * jnp.arange(C_out, dtype=jnp.float32)
    run_var = 1.0 + 0.03 * jnp.arange(C_out, dtype=jnp.float32)

    out = mobile_stem_forward(x, weight, gamma, beta, run_mean, run_var)
    out = jax.block_until_ready(out)

    ref = _reference(x, weight, gamma, beta, run_mean, run_var)
    # bf16 operands + bf16 output (f32 accumulation) -> loosened tolerance.
    np.testing.assert_allclose(np.asarray(out.astype(jnp.float32)),
                               np.asarray(ref), rtol=2e-2, atol=2e-2)

    print("KERNEL_OK")
</pallas_src>

<mosaic_0001>
module attributes {stable_mosaic.version = 11 : i64} {
  func.func @stem_kernel(%arg0: i32, %arg1: i32, %arg2: memref<32x36xbf16, #tpu.memory_space<vmem>>, %arg3: memref<32x1xf32, #tpu.memory_space<vmem>>, %arg4: memref<1x36x128xbf16, #tpu.memory_space<vmem>>, %arg5: memref<1x32x128xbf16, #tpu.memory_space<vmem>>) attributes {dimension_semantics = [#tpu.dimension_semantics<parallel>, #tpu.dimension_semantics<parallel>], iteration_bounds = array<i64: 1, 1>, scalar_prefetch = 0 : i64, scratch_operands = 0 : i64, tpu.core_type = #tpu.core_type<tc>, window_params = [{pipeline_mode = #tpu.pipeline_mode<synchronous>, transform_indices = @transform_0, window_bounds = array<i64: 32, 36>}, {pipeline_mode = #tpu.pipeline_mode<synchronous>, transform_indices = @transform_1, window_bounds = array<i64: 32, 1>}, {transform_indices = @transform_2, window_bounds = array<i64: 1, 36, 128>}, {transform_indices = @transform_3, window_bounds = array<i64: 1, 32, 128>}]} {
    %c0 = arith.constant 0 : index
    %c0_0 = arith.constant 0 : index
    %0 = vector.load %arg2[%c0, %c0_0] : memref<32x36xbf16, #tpu.memory_space<vmem>>, vector<32x36xbf16>
    %c0_1 = arith.constant 0 : index
    %c0_2 = arith.constant 0 : index
    %c0_3 = arith.constant 0 : index
    %1 = vector.load %arg4[%c0_1, %c0_2, %c0_3] : memref<1x36x128xbf16, #tpu.memory_space<vmem>>, vector<1x36x128xbf16>
    %2 = vector.shape_cast %1 : vector<1x36x128xbf16> to vector<36x128xbf16>
    %cst = arith.constant dense<0.000000e+00> : vector<32x128xf32>
    %3 = tpu.matmul %0, %2, %cst {dimension_numbers = #tpu.dot_dimension_numbers<[1], [0], [0], [1], [0, 0, 1, 1], [], []>} : vector<32x36xbf16>, vector<36x128xbf16>, vector<32x128xf32> -> vector<32x128xf32>
    %c0_4 = arith.constant 0 : index
    %c0_5 = arith.constant 0 : index
    %4 = vector.load %arg3[%c0_4, %c0_5] : memref<32x1xf32, #tpu.memory_space<vmem>>, vector<32x1xf32>
    %5 = vector.broadcast %4 : vector<32x1xf32> to vector<32x128xf32>
    %6 = arith.addf %3, %5 : vector<32x128xf32>
    %cst_6 = arith.constant 0.000000e+00 : f32
    %cst_7 = arith.constant 6.000000e+00 : f32
    %7 = vector.broadcast %cst_6 : f32 to vector<32x128xf32>
    %8 = arith.maximumf %7, %6 : vector<32x128xf32>
    %9 = vector.broadcast %cst_7 : f32 to vector<32x128xf32>
    %10 = arith.minimumf %9, %8 : vector<32x128xf32>
    %11 = arith.truncf %10 : vector<32x128xf32> to vector<32x128xbf16>
    %c0_8 = arith.constant 0 : index
    %c0_9 = arith.constant 0 : index
    %c0_10 = arith.constant 0 : index
    %12 = vector.load %arg5[%c0_8, %c0_9, %c0_10] : memref<1x32x128xbf16, #tpu.memory_space<vmem>>, vector<1x32x128xbf16>
    %13 = vector.shape_cast %12 : vector<1x32x128xbf16> to vector<32x128xbf16>
    %14 = vector.shape_cast %11 : vector<32x128xbf16> to vector<1x32x128xbf16>
    tpu.vector_store %arg5[%c0_8, %c0_9, %c0_10], %14 {strides = array<i32>} : memref<1x32x128xbf16, #tpu.memory_space<vmem>>, vector<1x32x128xbf16>,
    return
  }
  func.func @transform_0(%arg0: i32, %arg1: i32) -> (i32, i32) {
    %c0_i32 = arith.constant 0 : i32
    %c0_i32_0 = arith.constant 0 : i32
    %c0_i32_1 = arith.constant 0 : i32
    return %c0_i32, %c0_i32_0 : i32, i32
  }
  func.func @transform_1(%arg0: i32, %arg1: i32) -> (i32, i32) {
    %c0_i32 = arith.constant 0 : i32
    %c0_i32_0 = arith.constant 0 : i32
    %c0_i32_1 = arith.constant 0 : i32
    return %c0_i32, %c0_i32_0 : i32, i32
  }
  func.func @transform_2(%arg0: i32, %arg1: i32) -> (i32, i32, i32) {
    %c0_i32 = arith.constant 0 : i32
    %c0_i32_0 = arith.constant 0 : i32
    return %arg0, %c0_i32, %arg1 : i32, i32, i32
  }
  func.func @transform_3(%arg0: i32, %arg1: i32) -> (i32, i32, i32) {
    %c0_i32 = arith.constant 0 : i32
    %c0_i32_0 = arith.constant 0 : i32
    return %arg0, %c0_i32, %arg1 : i32, i32, i32
  }
}

</mosaic_0001>

<bundles_post_ra>
// kernel: mobile_stem_forward.1
= control target key start
LH: loop header
LB: loop body
LE: loop exit
PB: predicated region body
PF: predicated region fallthrough
CT: control target
= control target key end

     0   :  { %v162_v1 = vmov 0   ;;  %vm80_vm0 = vcmask 1041408   ;;  %vm73_vm1 = vcmask 293888   ;;  %s216_s2 = inlined_call_operand.vmem [shape: bf16[1,36,128], index: 2, kind: input, shape index: {}]   ;;  %s217_s1 = inlined_call_operand.vmem [shape: f32[32,1], index: 1, kind: input, shape index: {}]   ;;  %s218_s0 = inlined_call_operand.vmem [shape: bf16[32,36], index: 0, kind: input, shape index: {}]   ;;  %s219_s3 = inlined_call_operand.vmem [shape: bf16[1,32,128], index: 3, kind: output, shape index: {}]  }
   0x1   :  { %v23_v0 = vld [vmem:[%s216_s2 + $0x10] sm:$0x3]  ;;  %161 = vset.pattern.permute.xlu1 %v162_v1  ;;  %160 = vset.pattern.permute.xlu0 %v162_v1  ;;  %v24_v4 = vld [vmem:[%s217_s1] sm:$0xff]  ;;  %v144_v7 = vld [vmem:[%s216_s2 + $0x8] sm:$0xff] }
   0x2   :  { %v67_v2 = vunpack.c.l.b16 %v23_v0  ;;  %v26_v3 = vld [vmem:[%s217_s1 + $0x10] sm:$0xff]  ;;  %30 = vperm.xlu0 %160, %v24_v4   ;;  %v27_v8 = vld [vmem:[%s217_s1 + $0x18] sm:$0xff]  ;;  %v25_v9 = vld [vmem:[%s217_s1 + $0x8] sm:$0xff] }
   0x3   :  { %40 = vperm.xlu1 %161, %v26_v3   ;;  %v143_v10 = vld [vmem:[%s216_s2] sm:$0xff]  ;;  %v142_v12 = vld [vmem:[%s218_s0 + $0x8] sm:$0xff] }
   0x4   :  { %v70_v5 = vpack.c.b16 %v67_v2, %v67_v2  ;;  %v141_v11 = vld [vmem:[%s218_s0] sm:$0xff] }
   0x6   :  { %v82_v6 = vsel %vm80_vm0, %v70_v5, 0 }
   0x7   :  { %89 = vmatpush.bf16.msra.mxu0 %v82_v6  ;;  %156 = vmatpush.bf16.msra.mxu1 %v82_v6 }
   0xa   :  { %35 = vperm.xlu0 %160, %v25_v9  }
   0xb   :  { %90 = vmatpush.bf16.msra.mxu0 %v144_v7  ;;  %157 = vmatpush.bf16.msra.mxu1 %v144_v7 }
   0xc   :  { %45 = vperm.xlu1 %161, %v27_v8  }
   0xf   :  { %91 = vmatpush.bf16.msra.mxu0 %v143_v10  ;;  %158 = vmatpush.bf16.msra.mxu1 %v143_v10 }
  0x12   :  { %139 = vmatmul.msk.bf16.vlgmr.msra.gmra.mxu0 %vm73_vm1, %v141_v11  ;;  %140 = vmatmul.msk.bf16.vlgmr.msra.gmra.mxu1 %vm73_vm1, %v142_v12 }
  0x74   :  { %v31_v14 = vpop.permute.xlu0 %30 }
  0x75   :  { %v41_v13 = vpop.permute.xlu1 %40 }
  0x7c   :  { %v36_v20 = vpop.permute.xlu0 %35 }
  0x7e   :  { %v46_v19 = vpop.permute.xlu1 %45 }
  0x8f   :  { %v93_v15 = vpop.f32.mrf.mxu0  ;;  %v98_v16 = vpop.f32.mrf.mxu1 }
  0x90   :  { %v94_v17 = vadd.f32 %v93_v15, %v31_v14  ;;  %v99_v18 = vadd.f32 %v98_v16, %v41_v13 }
  0x92   :  { %v103_v23 = vmax.f32 %v94_v17, 0.0  ;;  %v105_v24 = vmax.f32 %v99_v18, 0.0 }
  0x94   :  { %v107_v29 = vmin.f32 %v103_v23, 6.0  ;;  %v109_v30 = vmin.f32 %v105_v24, 6.0 }
  0x97   :  { %v95_v21 = vpop.f32.mrf.mxu0  ;;  %v100_v22 = vpop.f32.mrf.mxu1 }
  0x98   :  { %v96_v25 = vadd.f32 %v95_v21, %v36_v20  ;;  %v101_v26 = vadd.f32 %v100_v22, %v46_v19 }
  0x9a   :  { %v104_v27 = vmax.f32 %v96_v25, 0.0  ;;  %v106_v28 = vmax.f32 %v101_v26, 0.0 }
  0x9c   :  { %v108_v31 = vmin.f32 %v104_v27, 6.0  ;;  %v110_v32 = vmin.f32 %v106_v28, 6.0 }
  0x9e   :  { %v148_v33 = vpack.c.bf16 %v108_v31, %v107_v29  ;;  %v153_v34 = vpack.c.bf16 %v110_v32, %v109_v30 }
  0xa0   :  { %149 = vst [vmem:[%s219_s3] sm:$0xff] %v148_v33  }
  0xa1   :  { %155 = vst [vmem:[%s219_s3 + $0x8] sm:$0xff] %v153_v34  }

</bundles_post_ra>
